<compile_context>
chip_gen: v6e
topology: v6e:2x2x1
jax: 0.10.0
libtpu: 0.0.40
codegen_flags: <defaults>
</compile_context>

<pallas_src>
import functools
import math

import jax
import jax.numpy as jnp
from jax.experimental import pallas as pl
from jax.experimental.pallas import tpu as pltpu


_SEG = 512          # lanes per segment row (multiple of 128 -> lane-dense stores)
_MAX_ROWS = 64      # max segment rows per grid step (multiple of 8)
_SIM_CHUNK = 4096   # max samples per serial-recursion kernel call (SMEM-bounded)


def _round_up(x, m):
    return ((x + m - 1) // m) * m


# ----------------------------------------------------------------------------
# Pallas kernels
# ----------------------------------------------------------------------------
def _fir_tile(sig_ref, w, seg):
    """acc[r, i] = sum_j w[j] * sig[r, i + order-1-j] on a (rows, seg+order-1) tile.

    w is a tuple of python-float taps (compile-time constants); each tap is a
    statically lane-shifted slice of the tile, so everything stays on the VPU
    (scalar-constant * vector FMAs) -- no MXU, no cross-lane reduce.
    """
    order = len(w)
    sig = sig_ref[...]                                   # (rows, seg + order - 1)
    off0 = order - 1
    acc = w[0] * sig[:, off0:off0 + seg]
    for j in range(1, order):
        off = order - 1 - j
        acc = acc + w[j] * sig[:, off:off + seg]
    return acc


def arx_predict_kernel(u_ref, y_ref, o_ref, *, b, a, seg):
    # u_ref: (rows, seg+ou-1), y_ref: (rows, seg+oy-1), o_ref: (rows, seg); VMEM.
    o_ref[...] = _fir_tile(u_ref, b, seg) + _fir_tile(y_ref, a, seg)


def arx_bu_kernel(u_ref, o_ref, *, b, seg):
    # Exogenous contribution only (simulate stage 1): bu[k] = B . u_reg[k].
    o_ref[...] = _fir_tile(u_ref, b, seg)


def arx_recursion_kernel(bu_ref, hin_ref, o_ref, hout_ref, *, a, chunk):
    # Serial ARX recursion over one chunk, everything scalar in SMEM:
    #   yhat[k] = bu[k] + sum_j a[j] * yhat[k-1-j]
    # History enters via hin_ref (order_y,) and leaves via hout_ref (order_y,),
    # so chunks are chained by lax.scan in the wrapper with bounded SMEM.
    p = len(a)
    h0 = tuple(hin_ref[j] for j in range(p))

    def step(k, h):
        # Only "+ a[0]*h[0]" sits on the loop-carried critical path; the other
        # history taps are summed off the chain (~2 scalar ops / sample).
        rest = bu_ref[k]
        for j in range(1, p):
            rest = rest + a[j] * h[j]
        acc = rest + a[0] * h[0]
        o_ref[k] = acc
        return (acc,) + h[:-1]                            # shift register in sregs

    h_end = jax.lax.fori_loop(0, chunk, step, h0, unroll=8)
    for j in range(p):
        hout_ref[j] = h_end[j]


# ----------------------------------------------------------------------------
# Module wrapper
# ----------------------------------------------------------------------------
class ARXPallas:
    def __init__(self, order_u, order_y, u_size=1, y_size=1, feedthrough=False, key=None):
        if u_size != 1 or y_size != 1:
            raise NotImplementedError()
        if feedthrough:
            raise NotImplementedError()
        self.order_u = int(order_u)
        self.order_y = int(order_y)
        key = jax.random.PRNGKey(0) if key is None else key
        k_a, k_b = jax.random.split(key)
        # deterministic init matching torch.nn.Linear default: U(-1/sqrt(in), 1/sqrt(in))
        bound_a = 1.0 / math.sqrt(self.order_y)
        bound_b = 1.0 / math.sqrt(self.order_u)
        self.A_w = jax.random.uniform(k_a, (1, self.order_y), jnp.float32, -bound_a, bound_a)
        self.B_w = jax.random.uniform(k_b, (1, self.order_u), jnp.float32, -bound_b, bound_b)
        # The parameters are a handful of scalars; bake them into the kernels as
        # compile-time constants (exact f32 round-trip; kernels re-specialize on change).
        self._a = tuple(float(v) for v in self.A_w.reshape(-1))
        self._b = tuple(float(v) for v in self.B_w.reshape(-1))

    def __call__(self, u, y=None):
        if y is None:
            return self.simulate(u)
        return self.predict(u, y)

    # -------- wrapper-side layout: overlapped sublane-dense segments ----------
    @staticmethod
    def _segment(x, order, n_seg_pad):
        """Row s = x_padded[s*SEG : s*SEG + SEG + order - 1] (halo = order-1)."""
        width = _SEG + order - 1
        total = n_seg_pad * _SEG + order - 1
        L = x.shape[0]
        if L < total:
            x = jnp.pad(x, (0, total - L))
        else:
            x = x[:total]
        idx = jnp.arange(n_seg_pad)[:, None] * _SEG + jnp.arange(width)[None, :]
        return x[idx]                                     # (n_seg_pad, width)

    @staticmethod
    def _tiling(n):
        n_seg = max(1, -(-n // _SEG))
        rows = min(_MAX_ROWS, _round_up(n_seg, 8))        # sublane rows per block
        n_seg_pad = _round_up(n_seg, rows)
        return n_seg_pad, rows

    # ---- one-step-ahead prediction: yhat = B(u_reg) + A(y_reg) ----
    def predict(self, u, y):
        u1 = jnp.asarray(u, jnp.float32).reshape(-1)
        y1 = jnp.asarray(y, jnp.float32).reshape(-1)
        n_u = u1.shape[0] - self.order_u - 1
        n_y = y1.shape[0] - self.order_y - 1
        if n_u != n_y:
            raise ValueError(
                "predict() requires equal regressor lengths: "
                f"len(u)-order_u-1={n_u} vs len(y)-order_y-1={n_y}")
        n = n_u
        n_seg_pad, rows = self._tiling(n)
        u_seg = self._segment(u1, self.order_u, n_seg_pad)
        y_seg = self._segment(y1, self.order_y, n_seg_pad)
        n_total = n_seg_pad * _SEG
        out = pl.pallas_call(
            functools.partial(arx_predict_kernel, b=self._b, a=self._a, seg=_SEG),
            out_shape=jax.ShapeDtypeStruct((n_seg_pad, _SEG), jnp.float32),
            grid=(n_seg_pad // rows,),
            in_specs=[
                pl.BlockSpec((rows, _SEG + self.order_u - 1), lambda i: (i, 0)),
                pl.BlockSpec((rows, _SEG + self.order_y - 1), lambda i: (i, 0)),
            ],
            out_specs=pl.BlockSpec((rows, _SEG), lambda i: (i, 0)),
            compiler_params=pltpu.CompilerParams(
                dimension_semantics=("parallel",),
                vmem_limit_bytes=32 * 1024 * 1024),
            cost_estimate=pl.CostEstimate(
                flops=2 * (self.order_u + self.order_y) * n_total,
                transcendentals=0,
                bytes_accessed=4 * (u_seg.size + y_seg.size + n_total)),
        )(u_seg, y_seg)
        return out.reshape(-1)[:n].reshape(n, 1)          # (N, 1), like torch predict

    # ---- free-run simulation: FIR stage + chunked serial recursion ----
    def _exogenous(self, u1, n):
        n_seg_pad, rows = self._tiling(n)
        u_seg = self._segment(u1, self.order_u, n_seg_pad)
        n_total = n_seg_pad * _SEG
        bu = pl.pallas_call(
            functools.partial(arx_bu_kernel, b=self._b, seg=_SEG),
            out_shape=jax.ShapeDtypeStruct((n_seg_pad, _SEG), jnp.float32),
            grid=(n_seg_pad // rows,),
            in_specs=[pl.BlockSpec((rows, _SEG + self.order_u - 1), lambda i: (i, 0))],
            out_specs=pl.BlockSpec((rows, _SEG), lambda i: (i, 0)),
            compiler_params=pltpu.CompilerParams(
                dimension_semantics=("parallel",),
                vmem_limit_bytes=32 * 1024 * 1024),
            cost_estimate=pl.CostEstimate(
                flops=2 * self.order_u * n_total,
                transcendentals=0,
                bytes_accessed=4 * (u_seg.size + n_total)),
        )(u_seg)
        return bu.reshape(-1)[:n]

    def simulate(self, u):
        u1 = jnp.asarray(u, jnp.float32).reshape(-1)
        n = u1.shape[0] - self.order_u - 1
        # Stage 1 (vector, VMEM, gridded, lane-dense): bu[k] = B . u_reg[k].
        bu = self._exogenous(u1, n)
        # Stage 2 (scalar, SMEM): serial recursion, chunked so SMEM stays bounded.
        # TODO(synk): fuse stage 1/2 into one kernel (saves the bu HBM round trip)
        # and/or switch to the MXU blocked-linear-recurrence formulation.
        ch = min(_SIM_CHUNK, _round_up(max(n, 1), 128))
        n_ch = -(-n // ch)
        bu_p = jnp.pad(bu, (0, n_ch * ch - n))
        bu2 = bu_p.reshape(n_ch, ch)

        sspec = pl.BlockSpec(memory_space=pltpu.MemorySpace.SMEM)
        rec = pl.pallas_call(
            functools.partial(arx_recursion_kernel, a=self._a, chunk=ch),
            out_shape=(jax.ShapeDtypeStruct((ch,), jnp.float32),
                       jax.ShapeDtypeStruct((self.order_y,), jnp.float32)),
            in_specs=[sspec, sspec],
            out_specs=(sspec, sspec),
        )

        def body(hist, bu_chunk):
            y_chunk, hist_out = rec(bu_chunk, hist)
            return hist_out, y_chunk

        hist0 = jnp.zeros((self.order_y,), jnp.float32)
        _, y2 = jax.lax.scan(body, hist0, bu2)
        return y2.reshape(-1)[:n]                         # (N,), like torch simulate


# ----------------------------------------------------------------------------
# pure-JAX references (for correctness check only)
# ----------------------------------------------------------------------------
def shift_signal(x, n_delay):
    L = x.shape[0]
    cols = [x[n_delay - 1 - i: L - 2 - i] for i in range(n_delay)]
    return jnp.stack(cols, axis=1)


def ref_predict(u, y, Bw, Aw, ou, oy):
    return shift_signal(u, ou) @ Bw.T + shift_signal(y, oy) @ Aw.T


def ref_simulate(u, Bw, Aw, ou, oy):
    u_s = shift_signal(u, ou)
    n = u.shape[0] - ou - 1
    yreg = jnp.zeros((oy,), jnp.float32)
    outs = []
    for k in range(n):
        yh = jnp.dot(u_s[k], Bw[0]) + jnp.dot(yreg, Aw[0])
        outs.append(yh)
        yreg = jnp.concatenate([yh[None], yreg[:-1]])
    return jnp.stack(outs)


if __name__ == "__main__":
    order_u, order_y, T = 3, 3, 16
    key = jax.random.PRNGKey(0)
    k_u, k_y, k_w, k_u2, k_y2 = jax.random.split(key, 5)
    u = jax.random.normal(k_u, (T,), jnp.float32)
    y = jax.random.normal(k_y, (T,), jnp.float32)

    model = ARXPallas(order_u, order_y, key=k_w)

    yhat_pred = model(u, y)      # forward(u, y)  -> predict
    yhat_sim = model(u)          # forward(u)     -> simulate
    jax.block_until_ready((yhat_pred, yhat_sim))

    ref_p = ref_predict(u, y, model.B_w, model.A_w, order_u, order_y)
    ref_s = ref_simulate(u, model.B_w, model.A_w, order_u, order_y)

    assert yhat_pred.shape == (T - order_u - 1, 1)
    assert yhat_sim.shape == (T - order_u - 1,)
    assert jnp.allclose(yhat_pred, ref_p, atol=1e-5, rtol=1e-5)
    assert jnp.allclose(yhat_sim, ref_s, atol=1e-5, rtol=1e-5)

    # Medium-length predict to exercise the multi-block grid / parallel axis.
    T2 = 40_000
    u2 = jax.random.normal(k_u2, (T2,), jnp.float32)
    y2 = jax.random.normal(k_y2, (T2,), jnp.float32)
    yhat2 = model(u2, y2)
    jax.block_until_ready(yhat2)
    ref2 = ref_predict(u2, y2, model.B_w, model.A_w, order_u, order_y)
    assert yhat2.shape == (T2 - order_u - 1, 1)
    assert jnp.allclose(yhat2, ref2, atol=1e-4, rtol=1e-4)

    print("KERNEL_OK")
</pallas_src>

<mosaic_0001>
module attributes {stable_mosaic.version = 11 : i64} {
  func.func @arx_predict_kernel(%arg0: i32, %arg1: memref<8x514xf32, #tpu.memory_space<vmem>>, %arg2: memref<8x514xf32, #tpu.memory_space<vmem>>, %arg3: memref<8x512xf32, #tpu.memory_space<vmem>>) attributes {dimension_semantics = [#tpu.dimension_semantics<parallel>], iteration_bounds = array<i64: 1>, scalar_prefetch = 0 : i64, scratch_operands = 0 : i64, tpu.core_type = #tpu.core_type<tc>, window_params = [{transform_indices = @transform_0, window_bounds = array<i64: 8, 514>}, {transform_indices = @transform_1, window_bounds = array<i64: 8, 514>}, {transform_indices = @transform_2, window_bounds = array<i64: 8, 512>}]} {
    %c0 = arith.constant 0 : index
    %c0_0 = arith.constant 0 : index
    %0 = vector.load %arg1[%c0, %c0_0] : memref<8x514xf32, #tpu.memory_space<vmem>>, vector<8x514xf32>
    %1 = vector.extract_strided_slice %0 {offsets = [0, 2], sizes = [8, 512], strides = [1, 1]} : vector<8x514xf32> to vector<8x512xf32>
    %cst = arith.constant 0.283694923 : f32
    %2 = vector.broadcast %cst : f32 to vector<8x512xf32>
    %3 = arith.mulf %2, %1 : vector<8x512xf32>
    %4 = vector.extract_strided_slice %0 {offsets = [0, 1], sizes = [8, 512], strides = [1, 1]} : vector<8x514xf32> to vector<8x512xf32>
    %cst_1 = arith.constant -0.178928435 : f32
    %5 = vector.broadcast %cst_1 : f32 to vector<8x512xf32>
    %6 = arith.mulf %5, %4 : vector<8x512xf32>
    %7 = arith.addf %3, %6 : vector<8x512xf32>
    %8 = vector.extract_strided_slice %0 {offsets = [0, 0], sizes = [8, 512], strides = [1, 1]} : vector<8x514xf32> to vector<8x512xf32>
    %cst_2 = arith.constant 0.288924843 : f32
    %9 = vector.broadcast %cst_2 : f32 to vector<8x512xf32>
    %10 = arith.mulf %9, %8 : vector<8x512xf32>
    %11 = arith.addf %7, %10 : vector<8x512xf32>
    %c0_3 = arith.constant 0 : index
    %c0_4 = arith.constant 0 : index
    %12 = vector.load %arg2[%c0_3, %c0_4] : memref<8x514xf32, #tpu.memory_space<vmem>>, vector<8x514xf32>
    %13 = vector.extract_strided_slice %12 {offsets = [0, 2], sizes = [8, 512], strides = [1, 1]} : vector<8x514xf32> to vector<8x512xf32>
    %cst_5 = arith.constant -0.497847974 : f32
    %14 = vector.broadcast %cst_5 : f32 to vector<8x512xf32>
    %15 = arith.mulf %14, %13 : vector<8x512xf32>
    %16 = vector.extract_strided_slice %12 {offsets = [0, 1], sizes = [8, 512], strides = [1, 1]} : vector<8x514xf32> to vector<8x512xf32>
    %cst_6 = arith.constant -0.352453262 : f32
    %17 = vector.broadcast %cst_6 : f32 to vector<8x512xf32>
    %18 = arith.mulf %17, %16 : vector<8x512xf32>
    %19 = arith.addf %15, %18 : vector<8x512xf32>
    %20 = vector.extract_strided_slice %12 {offsets = [0, 0], sizes = [8, 512], strides = [1, 1]} : vector<8x514xf32> to vector<8x512xf32>
    %cst_7 = arith.constant -0.28879118 : f32
    %21 = vector.broadcast %cst_7 : f32 to vector<8x512xf32>
    %22 = arith.mulf %21, %20 : vector<8x512xf32>
    %23 = arith.addf %19, %22 : vector<8x512xf32>
    %24 = arith.addf %11, %23 : vector<8x512xf32>
    %c0_8 = arith.constant 0 : index
    %c0_9 = arith.constant 0 : index
    %25 = vector.load %arg3[%c0_8, %c0_9] : memref<8x512xf32, #tpu.memory_space<vmem>>, vector<8x512xf32>
    tpu.vector_store %arg3[%c0_8, %c0_9], %24 {strides = array<i32>} : memref<8x512xf32, #tpu.memory_space<vmem>>, vector<8x512xf32>,
    return
  }
  func.func @transform_0(%arg0: i32) -> (i32, i32) {
    %c0_i32 = arith.constant 0 : i32
    %c0_i32_0 = arith.constant 0 : i32
    return %arg0, %c0_i32 : i32, i32
  }
  func.func @transform_1(%arg0: i32) -> (i32, i32) {
    %c0_i32 = arith.constant 0 : i32
    %c0_i32_0 = arith.constant 0 : i32
    return %arg0, %c0_i32 : i32, i32
  }
  func.func @transform_2(%arg0: i32) -> (i32, i32) {
    %c0_i32 = arith.constant 0 : i32
    %c0_i32_0 = arith.constant 0 : i32
    return %arg0, %c0_i32 : i32, i32
  }
}

</mosaic_0001>

<bundles_post_ra>
// kernel: tpu_custom_call.1
= control target key start
LH: loop header
LB: loop body
LE: loop exit
PB: predicated region body
PF: predicated region fallthrough
CT: control target
= control target key end

     0   :  { %7 = vsyncpa [#allocation3], 0  ;;  %s354_s0 = inlined_call_operand.hbm [shape: f32[8,514], index: 0, kind: input, shape index: {}]   ;;  %s355_s1 = inlined_call_operand.hbm [shape: f32[8,514], index: 1, kind: input, shape index: {}]   ;;  %s356_s2 = inlined_call_operand.hbm [shape: f32[8,512], index: 2, kind: output, shape index: {}]  }
   0x1   :  { %8 = vsyncpa [#allocation6], 0 }
   0x2   :  { %9 = vsyncpa [#allocation4], 0  ;;  %s305_s9 = smov [#allocation2]   ;;  %s306_s11 = smov [#allocation5]  }
   0x3   :  { %s16_s10 = sshll.u32 %s305_s9, 4  ;;  %s26_s12 = sshll.u32 %s306_s11, 4  ;;  %s17_s10 = int_to_ptr.vmem [resolvable:$true] %s16_s10  ;;  %s27_s12 = int_to_ptr.vmem [resolvable:$true] %s26_s12 }
   0x4   :  { %s247_s13 = scalar_lea.vmem %s17_s10, 640  ;;  %p252_p1 = scmp.lt.s32.totalorder %s17_s10, %s17_s10 }
   0x5   :  { %p248_p0 = scmp.ne.s32.totalorder %s17_s10, %s247_s13  ;;  %p253_p2 = scmp.lt.s32.totalorder %s247_s13, %s247_s13 }
   0x7   :  { %p254_p3 = por %p253_p2, %p252_p1 }
   0x9   :  { %p255_p4 = pnand %p254_p3, %p248_p0 }
   0xb   :  { %258 = shalt.err (!%p255_p4)
}
   0xc   :  { %19 = dma.hbm_to_vmem [thread:$0]  %s354_s0, 640, %s17_s10, [#allocation3]  }
   0xd   :  { %s267_s16 = scalar_lea.vmem %s27_s12, 640  ;;  %p272_p6 = scmp.lt.s32.totalorder %s27_s12, %s27_s12 }
   0xe   :  { %p268_p5 = scmp.ne.s32.totalorder %s27_s12, %s267_s16  ;;  %p273_p7 = scmp.lt.s32.totalorder %s267_s16, %s267_s16 }
  0x10   :  { %p274_p8 = por %p273_p7, %p272_p6 }
  0x12   :  { %p275_p9 = pnand %p274_p8, %p268_p5 }
  0x14   :  { %278 = shalt.err (!%p275_p9)
}
  0x15   :  { %29 = dma.hbm_to_vmem [thread:$0]  %s355_s1, 640, %s27_s12, [#allocation6]  }
  0x16   :  { %299 = dma.done.wait [#allocation3], 640  }
  0x17   :  { %300 = vsyncadd [#allocation3], 4294966656 }
  0x18   :  { %301 = dma.done.wait [#allocation6], 640  }
  0x19   :  { %302 = vsyncadd [#allocation6], 4294966656  ;;  %v332_v0 = vld [vmem:[#allocation2 + $0x10] sm:$0xff]  ;;  %v36_v1 = vld [vmem:[#allocation2] sm:$0xff]  ;;  %s307_s0 = smov 1   ;;  %s308_s1 = smov 2  }
  0x1a   :  { %v39_v2 = vld [vmem:[#allocation2 + $0x18] sm:$0xff]  ;;  %v48_v3 = vmul.f32 -0.17892843, %v332_v0  ;;  %v46_v4 = vmul.f32 -0.17892843, %v36_v1  ;;  %v37_v5 = vld [vmem:[#allocation2 + $0x8] sm:$0xff] }
  0x1b   :  { %v49_v6 = vmul.f32 -0.17892843, %v39_v2  ;;  %v47_v7 = vmul.f32 -0.17892843, %v37_v5  ;;  %v111_v8 = vld [vmem:[#allocation5] sm:$0xff]  ;;  %v40_v9 = vld [vmem:[#allocation2 + $0x20] sm:$0xff] }
  0x1c   :  { %60 = vrot.lane.b32.xlu1 %v48_v3, %s307_s0  ;;  %56 = vrot.lane.b32.xlu0 %v46_v4, %s307_s0  ;;  %v121_v10 = vmul.f32 -0.35245326, %v111_v8  ;;  %v50_v11 = vmul.f32 -0.17892843, %v40_v9  ;;  %v113_v12 = vld [vmem:[#allocation5 + $0x10] sm:$0xff]  ;;  %v112_v13 = vld [vmem:[#allocation5 + $0x8] sm:$0xff] }
  0x1d   :  { %v123_v14 = vmul.f32 -0.35245326, %v113_v12  ;;  %v122_v15 = vmul.f32 -0.35245326, %v112_v13  ;;  %v115_v16 = vld [vmem:[#allocation5 + $0x20] sm:$0xff]  ;;  %v114_v17 = vld [vmem:[#allocation5 + $0x18] sm:$0xff] }
  0x1e   :  { %v125_v18 = vmul.f32 -0.35245326, %v115_v16  ;;  %v124_v19 = vmul.f32 -0.35245326, %v114_v17  ;;  %v82_v20 = vmul.f32 0.28892484, %v37_v5 }
  0x1f   :  { %v81_v21 = vmul.f32 0.28892484, %v36_v1  ;;  %v84_v22 = vmul.f32 0.28892484, %v39_v2  ;;  %v83_v23 = vmul.f32 0.28892484, %v332_v0 }
  0x20   :  { %62 = vrot.lane.b32.xlu1 %v49_v6, %s307_s0  ;;  %58 = vrot.lane.b32.xlu0 %v47_v7, %s307_s0  ;;  %v156_v24 = vmul.f32 -0.28879118, %v112_v13  ;;  %v155_v25 = vmul.f32 -0.28879118, %v111_v8  ;;  %v158_v26 = vmul.f32 -0.28879118, %v114_v17 }
  0x21   :  { %v157_v27 = vmul.f32 -0.28879118, %v113_v12  ;;  %v41_v40 = vmul.f32 0.28369492, %v36_v1  ;;  %vm66_vm0 = vcmask 7168   ;;  %vm97_vm1 = vcmask 15360  }
  0x22   :  { %v44_v41 = vmul.f32 0.28369492, %v39_v2  ;;  %v42_v42 = vmul.f32 0.28369492, %v37_v5  ;;  %v116_v43 = vmul.f32 -0.49784797, %v111_v8 }
  0x23   :  { %v43_v44 = vmul.f32 0.28369492, %v332_v0  ;;  %v117_v45 = vmul.f32 -0.49784797, %v112_v13  ;;  %v45_v49 = vmul.f32 0.28369492, %v40_v9 }
  0x24   :  { %131 = vrot.lane.b32.xlu1 %v121_v10, %s307_s0  ;;  %64 = vrot.lane.b32.xlu0 %v50_v11, %s307_s0  ;;  %v118_v50 = vmul.f32 -0.49784797, %v113_v12  ;;  %v119_v54 = vmul.f32 -0.49784797, %v114_v17  ;;  %v120_v55 = vmul.f32 -0.49784797, %v115_v16 }
  0x25   :  { %s309_s19 = smov 126   ;;  %vm204_vm2 = vcmask 1031168   ;;  %s310_s20 = smov [#allocation7]  }
  0x26   :  { %s223_s21 = sshll.u32 %s310_s20, 4  ;;  %s224_s21 = int_to_ptr.vmem [resolvable:$true] %s223_s21 }
  0x27   :  { %s279_s22 = scalar_lea.vmem %s224_s21, 512  ;;  %p284_p11 = scmp.lt.s32.totalorder %s224_s21, %s224_s21 }
  0x28   :  { %135 = vrot.lane.b32.xlu1 %v123_v14, %s307_s0  ;;  %133 = vrot.lane.b32.xlu0 %v122_v15, %s307_s0  ;;  %p280_p10 = scmp.ne.s32.totalorder %s224_s21, %s279_s22  ;;  %p285_p12 = scmp.lt.s32.totalorder %s279_s22, %s279_s22 }
  0x2a   :  { %p286_p13 = por %p285_p12, %p284_p11 }
  0x2c   :  { %139 = vrot.lane.b32.xlu1 %v125_v18, %s307_s0  ;;  %137 = vrot.lane.b32.xlu0 %v124_v19, %s307_s0  ;;  %p287_p0 = pnand %p286_p13, %p280_p10 }
  0x30   :  { %91 = vrot.lane.b32.xlu1 %v82_v20, %s308_s1  ;;  %89 = vrot.lane.b32.xlu0 %v81_v21, %s308_s1 }
  0x34   :  { %95 = vrot.lane.b32.xlu1 %v84_v22, %s308_s1  ;;  %93 = vrot.lane.b32.xlu0 %v83_v23, %s308_s1 }
  0x38   :  { %165 = vrot.lane.b32.xlu1 %v156_v24, %s308_s1  ;;  %163 = vrot.lane.b32.xlu0 %v155_v25, %s308_s1 }
  0x3c   :  { %169 = vrot.lane.b32.xlu1 %v158_v26, %s308_s1  ;;  %167 = vrot.lane.b32.xlu0 %v157_v27, %s308_s1 }
  0x8e   :  { %v61_v28 = vpop.permute.xlu1 %60  ;;  %v57_v29 = vpop.permute.xlu0 %56 }
  0x8f   :  { %v76_v52 = vadd.f32 %v57_v29, %v41_v40 }
  0x92   :  { %v63_v30 = vpop.permute.xlu1 %62  ;;  %v59_v31 = vpop.permute.xlu0 %58 }
  0x93   :  { %v67_v48 = vsel %vm66_vm0, %v57_v29, %v59_v31  ;;  %v69_v53 = vsel %vm66_vm0, %v61_v28, %v63_v30  ;;  %v68_v56 = vsel %vm66_vm0, %v59_v31, %v61_v28 }
  0x94   :  { %v77_v60 = vadd.f32 %v67_v48, %v42_v42  ;;  %v79_v6 = vadd.f32 %v69_v53, %v44_v41  ;;  %v78_v14 = vadd.f32 %v68_v56, %v43_v44 }
  0x96   :  { %v132_v32 = vpop.permute.xlu1 %131  ;;  %v65_v33 = vpop.permute.xlu0 %64 }
  0x97   :  { %v150_v57 = vadd.f32 %v132_v32, %v116_v43  ;;  %v70_v58 = vsel %vm66_vm0, %v63_v30, %v65_v33 }
  0x98   :  { %v80_v7 = vadd.f32 %v70_v58, %v45_v49 }
  0x9a   :  { %v136_v34 = vpop.permute.xlu1 %135  ;;  %v134_v35 = vpop.permute.xlu0 %133 }
  0x9b   :  { %v141_v51 = vsel %vm66_vm0, %v132_v32, %v134_v35  ;;  %v142_v61 = vsel %vm66_vm0, %v134_v35, %v136_v34 }
  0x9c   :  { %v151_v62 = vadd.f32 %v141_v51, %v117_v45  ;;  %v152_v15 = vadd.f32 %v142_v61, %v118_v50 }
  0x9e   :  { %v140_v36 = vpop.permute.xlu1 %139  ;;  %v138_v37 = vpop.permute.xlu0 %137 }
  0x9f   :  { %v144_v63 = vsel %vm66_vm0, %v138_v37, %v140_v36  ;;  %v143_v2 = vsel %vm66_vm0, %v136_v34, %v138_v37 }
  0xa0   :  { %v154_v10 = vadd.f32 %v144_v63, %v120_v55  ;;  %v153_v16 = vadd.f32 %v143_v2, %v119_v54 }
  0xa2   :  { %v92_v38 = vpop.permute.xlu1 %91  ;;  %v90_v39 = vpop.permute.xlu0 %89 }
  0xa3   :  { %v98_v59 = vsel %vm97_vm1, %v90_v39, %v92_v38  ;;  %v106_v3 = vadd.f32 %v90_v39, %v76_v52 }
  0xa4   :  { %v107_v8 = vadd.f32 %v98_v59, %v77_v60 }
  0xa6   :  { %v96_v46 = vpop.permute.xlu1 %95  ;;  %v94_v47 = vpop.permute.xlu0 %93 }
  0xa7   :  { %v99_v11 = vsel %vm97_vm1, %v92_v38, %v94_v47  ;;  %v100_v12 = vsel %vm97_vm1, %v94_v47, %v96_v46  ;;  %v110_v20 = vadd.f32 %v96_v46, %v80_v7 }
  0xa8   :  { %v108_v24 = vadd.f32 %v99_v11, %v78_v14  ;;  %v109_v25 = vadd.f32 %v100_v12, %v79_v6 }
  0xaa   :  { %v166_v0 = vpop.permute.xlu1 %165  ;;  %v164_v1 = vpop.permute.xlu0 %163 }
  0xab   :  { %v171_v4 = vsel %vm97_vm1, %v164_v1, %v166_v0  ;;  %v179_v5 = vadd.f32 %v164_v1, %v150_v57 }
  0xac   :  { %v180_v9 = vadd.f32 %v171_v4, %v151_v62 }
  0xad   :  { %v184_v13 = vadd.f32 %v179_v5, %v106_v3 }
  0xae   :  { %v170_v17 = vpop.permute.xlu1 %169  ;;  %v168_v18 = vpop.permute.xlu0 %167  ;;  %v185_v19 = vadd.f32 %v180_v9, %v107_v8 }
  0xaf   :  { %v183_v21 = vadd.f32 %v170_v17, %v154_v10  ;;  %v172_v22 = vsel %vm97_vm1, %v166_v0, %v168_v18  ;;  %v173_v23 = vsel %vm97_vm1, %v168_v18, %v170_v17  ;;  %194 = vrot.lane.b32.xlu0 %v184_v13, %s309_s19 }
  0xb0   :  { %v181_v26 = vadd.f32 %v172_v22, %v152_v15  ;;  %v182_v27 = vadd.f32 %v173_v23, %v153_v16  ;;  %196 = vrot.lane.b32.xlu1 %v185_v19, %s309_s19 }
  0xb1   :  { %v188_v28 = vadd.f32 %v183_v21, %v110_v20 }
  0xb2   :  { %v187_v29 = vadd.f32 %v182_v27, %v109_v25  ;;  %v186_v30 = vadd.f32 %v181_v26, %v108_v24 }
  0xb4   :  { %200 = vrot.lane.b32.xlu1 %v187_v29, %s309_s19  ;;  %198 = vrot.lane.b32.xlu0 %v186_v30, %s309_s19 }
  0xb8   :  { %202 = vrot.lane.b32.xlu0 %v188_v28, %s309_s19 }
 0x121   :  { %v195_v31 = vpop.permute.xlu0 %194 }
 0x122   :  { %v197_v32 = vpop.permute.xlu1 %196 }
 0x123   :  { %v205_v33 = vsel %vm204_vm2, %v195_v31, %v197_v32 }
 0x124   :  { %213 = vst [vmem:[#allocation7] sm:$0xff] %v205_v33 }
 0x126   :  { %v201_v34 = vpop.permute.xlu1 %200  ;;  %v199_v35 = vpop.permute.xlu0 %198 }
 0x127   :  { %v206_v36 = vsel %vm204_vm2, %v197_v32, %v199_v35  ;;  %v207_v37 = vsel %vm204_vm2, %v199_v35, %v201_v34 }
 0x128   :  { %214 = vst [vmem:[#allocation7 + $0x8] sm:$0xff] %v206_v36  ;;  %215 = vst [vmem:[#allocation7 + $0x10] sm:$0xff] %v207_v37 }
 0x12a   :  { %v203_v38 = vpop.permute.xlu0 %202 }
 0x12b   :  { %v208_v39 = vsel %vm204_vm2, %v201_v34, %v203_v38 }
 0x12c   :  { %216 = vst [vmem:[#allocation7 + $0x18] sm:$0xff] %v208_v39 }
 0x12d   :  { %290 = shalt.err (!%p287_p0)
}
 0x12e   :  { %226 = dma.vmem_to_hbm [thread:$0]  %s224_s21, 512, %s356_s2, [#allocation4]  }
 0x12f   :  { %303 = dma.done.wait [#allocation4], 512  }
 0x130   :  { %304 = vsyncadd [#allocation4], 4294966784 }
 0x131   :  { %230 = vsyncpa [#allocation3], 1 }
 0x132   :  { %231 = vsyncpa [#allocation6], 1 }
 0x133   :  { %232 = vsyncpa [#allocation4], 1 }

</bundles_post_ra>
